<compile_context>
chip_gen: v7x
topology: tpu7x:2x2x1
jax: 0.10.0
libtpu: 0.0.40
codegen_flags: <defaults>
</compile_context>

<pallas_src>
import functools

import jax
import jax.numpy as jnp
import numpy as np
from jax.experimental import pallas as pl
from jax.experimental.pallas import tpu as pltpu


def _pooler_kernel(x_ref, w_ref, b_ref, o_ref, *, matmul_dtype):
    """pooled = tanh(x @ W + b) for one row-tile of the batch.

    x_ref: (tb, H)  first-token activations (input dtype; cast here)
    w_ref: (H, H)   weight in (in, out) layout, already matmul_dtype
    b_ref: (1, H)   bias (f32)
    o_ref: (tb, H)  pooled output
    """
    x = x_ref[...].astype(matmul_dtype)
    acc = jnp.dot(x, w_ref[...], preferred_element_type=jnp.float32)
    acc = acc + b_ref[...]                            # f32 bias add (VPU)
    o_ref[...] = jnp.tanh(acc).astype(o_ref.dtype)    # tanh -> EUP


def prepare_pooler_params(weight, bias, *, matmul_dtype=jnp.bfloat16):
    """One-time (init-time) parameter transform — keep OUT of the hot path.

    weight: (H, H) torch nn.Linear layout (out_features, in_features)
    bias:   (H,)
    returns (w_io, b_row): weight as (in, out) in matmul_dtype, bias as (1, H) f32.
    """
    w_io = jnp.asarray(weight).T.astype(matmul_dtype)
    b_row = jnp.asarray(bias).reshape(1, -1).astype(jnp.float32)
    return w_io, b_row


def _pick_row_block(batch, *, max_tb=512):
    """Row-tile choice.

    - batch < 16: one tile (grid = 1). The op is launch/HBM-bound; extra grid
      steps only add ~0.35 us each (v5e/v6e preference, nothing to split anyway).
    - batch >= 16: largest multiple of 8 <= ceil(batch/2), capped at max_tb,
      so the grid has >= 2 steps and both v7x TensorCores get work.
    """
    if batch < 16:
        return batch
    half = -(-batch // 2)                # ceil(batch / 2)
    tb = max(8, (half // 8) * 8)         # multiple of 8 -> clean (8,128) layout
    return min(tb, max_tb)


def bert_pooler(hidden_states, w_io, b_row, *,
                matmul_dtype=jnp.bfloat16, block_b=None, max_tb=512):
    """BertPooler.forward.

    hidden_states: (B, S, H)
    w_io:          (H, H) weight in (in, out) layout (from prepare_pooler_params)
    b_row:         (1, H) f32 bias        (from prepare_pooler_params)
    returns:       (B, H) = tanh(hidden_states[:, 0] @ W_io + b)
    """
    B, S, H = hidden_states.shape
    out_dtype = hidden_states.dtype

    # Fuse the [:, 0] slice into the pallas_call.  The collapse reshape is
    # free (no copy); the first H lanes of each (S*H)-wide row ARE the
    # first-token activations, and the BlockSpec below DMAs exactly that slab.
    if H % 128 == 0 or S == 1:
        x = hidden_states.reshape(B, S * H)
    else:
        # Fallback for non-lane-aligned H (BlockSpec last dim must be a
        # multiple of 128 or the full array dim): slice in the wrapper.
        x = hidden_states[:, 0, :]

    tb = block_b if block_b is not None else _pick_row_block(B, max_tb=max_tb)
    grid = (pl.cdiv(B, tb),)

    xb = jnp.dtype(hidden_states.dtype).itemsize
    wb = jnp.dtype(w_io.dtype).itemsize
    ob = jnp.dtype(out_dtype).itemsize

    # VMEM budget (double-buffered tiles + resident weight/bias) with headroom.
    vmem_need = (2 * tb * H * xb + 2 * H * H * wb + 2 * H * 4 + 2 * tb * H * ob)
    vmem_limit = int(min(max(2 * vmem_need, 16 * 2**20), 64 * 2**20))

    cost = pl.CostEstimate(
        flops=2 * B * H * H,
        transcendentals=B * H,
        bytes_accessed=H * H * wb + B * H * xb + H * 4 + B * H * ob,
    )

    kernel = functools.partial(_pooler_kernel, matmul_dtype=matmul_dtype)

    return pl.pallas_call(
        kernel,
        out_shape=jax.ShapeDtypeStruct((B, H), out_dtype),
        grid=grid,
        in_specs=[
            # First-token rows: column-block 0 of the (B, S*H) view.
            pl.BlockSpec((tb, H), lambda i: (i, 0)),
            # Weight / bias: constant index_map -> fetched once, VMEM-resident.
            pl.BlockSpec((H, H), lambda i: (0, 0)),
            pl.BlockSpec((1, H), lambda i: (0, 0)),
        ],
        out_specs=pl.BlockSpec((tb, H), lambda i: (i, 0)),
        compiler_params=pltpu.CompilerParams(
            dimension_semantics=("parallel",),     # shard row tiles across TCs (v7x)
            vmem_limit_bytes=vmem_limit,
        ),
        cost_estimate=cost,
    )(x, w_io, b_row)


if __name__ == "__main__":
    # Small, lane/sublane-friendly shapes consistent with the module's forward:
    # batch=8, seq=16, hidden=128.
    B, S, H = 8, 16, 128

    key = jax.random.PRNGKey(0)
    k_x, k_w, k_b = jax.random.split(key, 3)

    hidden_states = jax.random.normal(k_x, (B, S, H), jnp.float32)
    weight = 0.02 * jax.random.normal(k_w, (H, H), jnp.float32)   # torch (out, in)
    bias = 0.02 * jax.random.normal(k_b, (H,), jnp.float32)

    # Reference (exact PyTorch semantics, f32).
    ref = jnp.tanh(hidden_states[:, 0, :] @ weight.T + bias)

    # Default bf16-MXU path (params prepared once, outside the hot path).
    w_io, b_row = prepare_pooler_params(weight, bias, matmul_dtype=jnp.bfloat16)
    out = jax.block_until_ready(bert_pooler(hidden_states, w_io, b_row))
    assert out.shape == (B, H), out.shape
    np.testing.assert_allclose(np.asarray(out), np.asarray(ref), atol=5e-2, rtol=0)

    # f32 parity path (bandwidth-bound op, so f32 MXU passes cost little).
    w_io32, b_row32 = prepare_pooler_params(weight, bias, matmul_dtype=jnp.float32)
    out32 = jax.block_until_ready(
        bert_pooler(hidden_states, w_io32, b_row32, matmul_dtype=jnp.float32))
    np.testing.assert_allclose(np.asarray(out32), np.asarray(ref), atol=1e-5, rtol=1e-5)

    print("KERNEL_OK")
</pallas_src>

<mosaic_0001>
module attributes {stable_mosaic.version = 11 : i64} {
  func.func @_pooler_kernel(%arg0: i32, %arg1: memref<8x128xf32, #tpu.memory_space<vmem>>, %arg2: memref<128x128xbf16, #tpu.memory_space<vmem>>, %arg3: memref<1x128xf32, #tpu.memory_space<vmem>>, %arg4: memref<8x128xf32, #tpu.memory_space<vmem>>) attributes {dimension_semantics = [#tpu.dimension_semantics<parallel>], iteration_bounds = array<i64: 1>, scalar_prefetch = 0 : i64, scratch_operands = 0 : i64, tpu.core_type = #tpu.core_type<tc>, window_params = [{transform_indices = @transform_0, window_bounds = array<i64: 8, 128>}, {pipeline_mode = #tpu.pipeline_mode<synchronous>, transform_indices = @transform_1, window_bounds = array<i64: 128, 128>}, {pipeline_mode = #tpu.pipeline_mode<synchronous>, transform_indices = @transform_2, window_bounds = array<i64: 1, 128>}, {transform_indices = @transform_3, window_bounds = array<i64: 8, 128>}]} {
    %c0 = arith.constant 0 : index
    %c0_0 = arith.constant 0 : index
    %0 = vector.load %arg1[%c0, %c0_0] : memref<8x128xf32, #tpu.memory_space<vmem>>, vector<8x128xf32>
    %1 = arith.truncf %0 : vector<8x128xf32> to vector<8x128xbf16>
    %c0_1 = arith.constant 0 : index
    %c0_2 = arith.constant 0 : index
    %2 = vector.load %arg2[%c0_1, %c0_2] : memref<128x128xbf16, #tpu.memory_space<vmem>>, vector<128x128xbf16>
    %cst = arith.constant dense<0.000000e+00> : vector<8x128xf32>
    %3 = tpu.matmul %1, %2, %cst {dimension_numbers = #tpu.dot_dimension_numbers<[1], [0], [0], [1], [0, 0, 1, 1], [], []>} : vector<8x128xbf16>, vector<128x128xbf16>, vector<8x128xf32> -> vector<8x128xf32>
    %c0_3 = arith.constant 0 : index
    %c0_4 = arith.constant 0 : index
    %4 = vector.load %arg3[%c0_3, %c0_4] : memref<1x128xf32, #tpu.memory_space<vmem>>, vector<1x128xf32>
    %5 = vector.broadcast %4 : vector<1x128xf32> to vector<8x128xf32>
    %6 = arith.addf %3, %5 : vector<8x128xf32>
    %7 = math.tanh %6 : vector<8x128xf32>
    %c0_5 = arith.constant 0 : index
    %c0_6 = arith.constant 0 : index
    %8 = vector.load %arg4[%c0_5, %c0_6] : memref<8x128xf32, #tpu.memory_space<vmem>>, vector<8x128xf32>
    tpu.vector_store %arg4[%c0_5, %c0_6], %7 {strides = array<i32>} : memref<8x128xf32, #tpu.memory_space<vmem>>, vector<8x128xf32>,
    return
  }
  func.func @transform_0(%arg0: i32) -> (i32, i32) {
    %c0_i32 = arith.constant 0 : i32
    %c0_i32_0 = arith.constant 0 : i32
    return %arg0, %c0_i32 : i32, i32
  }
  func.func @transform_1(%arg0: i32) -> (i32, i32) {
    %c0_i32 = arith.constant 0 : i32
    %c0_i32_0 = arith.constant 0 : i32
    %c0_i32_1 = arith.constant 0 : i32
    return %c0_i32, %c0_i32_0 : i32, i32
  }
  func.func @transform_2(%arg0: i32) -> (i32, i32) {
    %c0_i32 = arith.constant 0 : i32
    %c0_i32_0 = arith.constant 0 : i32
    %c0_i32_1 = arith.constant 0 : i32
    return %c0_i32, %c0_i32_0 : i32, i32
  }
  func.func @transform_3(%arg0: i32) -> (i32, i32) {
    %c0_i32 = arith.constant 0 : i32
    %c0_i32_0 = arith.constant 0 : i32
    return %arg0, %c0_i32 : i32, i32
  }
}

</mosaic_0001>

<bundles_post_ra>
// kernel: tpu_custom_call.1
= control target key start
LH: loop header
LB: loop body
LE: loop exit
PB: predicated region body
PF: predicated region fallthrough
CT: control target
= control target key end

     0   :  { %8 = vsyncpa [#allocation3], 0  ;;  %s376_s0 = inlined_call_operand.hbm [shape: f32[8,2048], index: 0, kind: input, shape index: {}]   ;;  %s377_s1 = inlined_call_operand.hbm [shape: bf16[128,128], index: 1, kind: input, shape index: {}]   ;;  %s378_s2 = inlined_call_operand.vmem [shape: f32[1,128], index: 2, kind: input, shape index: {}]   ;;  %s379_s3 = inlined_call_operand.hbm [shape: f32[8,128], index: 3, kind: output, shape index: {}]  }
   0x1   :  { %9 = vsyncpa [#allocation6], 0 }
   0x2   :  { %10 = vsyncpa [#allocation4], 0  ;;  %s300_s12 = smov [#allocation2]   ;;  %s301_s14 = smov [#allocation5]  }
   0x3   :  { %s17_s13 = sshll.u32 %s300_s12, 4  ;;  %s26_s15 = sshll.u32 %s301_s14, 4  ;;  %s18_s13 = int_to_ptr.vmem [resolvable:$true] %s17_s13  ;;  %s327_s15 = int_to_ptr.vmem [resolvable:$true] %s26_s15 }
   0x4   :  { %s228_s18 = scalar_lea.hbm %s376_s0, 128  ;;  %s230_s23 = scalar_lea.hbm %s376_s0, 2048 }
   0x5   :  { %p229_p0 = scmp.ne.s32.totalorder %s376_s0, %s228_s18  ;;  %p231_p1 = scmp.lt.u32.totalorder %s230_s23, %s228_s18 }
   0x6   :  { %p232_p2 = scmp.lt.u32.totalorder %s228_s18, %s376_s0 }
   0x8   :  { %p233_p3 = por %p232_p2, %p231_p1 }
   0xa   :  { %p234_p4 = pnand %p233_p3, %p229_p0 }
   0xc   :  { %237 = shalt.err (!%p234_p4)
}
   0xd   :  { %s238_s26 = scalar_lea.vmem %s18_s13, 128  ;;  %p243_p6 = scmp.lt.s32.totalorder %s18_s13, %s18_s13 }
   0xe   :  { %p239_p5 = scmp.ne.s32.totalorder %s18_s13, %s238_s26  ;;  %p244_p7 = scmp.lt.s32.totalorder %s238_s26, %s238_s26 }
  0x10   :  { %p245_p8 = por %p244_p7, %p243_p6 }
  0x12   :  { %p246_p9 = pnand %p245_p8, %p239_p5 }
  0x14   :  { %249 = shalt.err (!%p246_p9)
}
  0x15   :  { %20 = dma.hbm_to_vmem [thread:$0]  %s376_s0, 128, %s18_s13, [#allocation3]  }
  0x16   :  { %s250_s4 = scalar_lea.hbm %s377_s1, 1024 }
  0x17   :  { %p251_p10 = scmp.ne.s32.totalorder %s377_s1, %s250_s4  ;;  %p254_p11 = scmp.lt.u32.totalorder %s250_s4, %s377_s1 }
  0x19   :  { %p256_p12 = pnand %p254_p11, %p251_p10 }
  0x1b   :  { %259 = shalt.err (!%p256_p12)
}
  0x1c   :  { %s260_s9 = scalar_lea.vmem %s327_s15, 1024  ;;  %p265_p0 = scmp.lt.s32.totalorder %s327_s15, %s327_s15 }
  0x1d   :  { %p261_p13 = scmp.ne.s32.totalorder %s327_s15, %s260_s9  ;;  %p266_p1 = scmp.lt.s32.totalorder %s260_s9, %s260_s9 }
  0x1f   :  { %p267_p2 = por %p266_p1, %p265_p0 }
  0x21   :  { %p268_p3 = pnand %p267_p2, %p261_p13 }
  0x23   :  { %271 = shalt.err (!%p268_p3)
}
  0x24   :  { %s302_s0 = smov 64   ;;  %s303_s10 = smov 4  }
  0x25   :  { %32 = dma.hbm_to_vmem [thread:$0]  %s377_s1, 1024, %s327_s15, [#allocation6], %s302_s0, %s302_s0, %s303_s10  }
  0x26   :  { %294 = dma.done.wait [#allocation3], 128  }
  0x27   :  { %295 = vsyncadd [#allocation3], 4294967168 }
  0x28   :  { %296 = dma.done.wait [#allocation6], 1024  }
  0x29   :  { %297 = vsyncadd [#allocation6], 4294966272  ;;  %v304_v0 = vmov 0.0   ;;  %vm305_vm0 = vmmov 0   ;;  %v218_v1 = vld [vmem:[#allocation5] sm:$0xff]   ;;  %v219_v2 = vld [vmem:[#allocation5 + $0x8] sm:$0xff]  }
  0x2a   :  { %191 = vmatprep.subr.bf16.mxu0 %v304_v0  ;;  %207 = vmatprep.mubr.msk.bf16.mxu0 %vm305_vm0, %v304_v0  ;;  %v220_v3 = vld [vmem:[#allocation5 + $0x10] sm:$0xff]   ;;  %v221_v4 = vld [vmem:[#allocation5 + $0x18] sm:$0xff]   ;;  %v222_v5 = vld [vmem:[#allocation5 + $0x20] sm:$0xff]   ;;  %s306_s14 = smov [#allocation7]  }
  0x2b   :  { %192 = vmatpush3.bf16.msra.mxu0 %v218_v1  ;;  %v223_v6 = vld [vmem:[#allocation5 + $0x28] sm:$0xff]   ;;  %v224_v7 = vld [vmem:[#allocation5 + $0x30] sm:$0xff]   ;;  %v225_v8 = vld [vmem:[#allocation5 + $0x38] sm:$0xff]   ;;  %s163_s15 = sshll.u32 %s306_s14, 4  ;;  %s164_s15 = int_to_ptr.vmem [resolvable:$true] %s163_s15 }
  0x2c   :  { %193 = vmatprep.subr.bf16.mxu0 %v304_v0  ;;  %v42_v9 = vld [vmem:[#allocation2] sm:$0xff]  ;;  %s272_s16 = scalar_lea.vmem %s164_s15, 128  ;;  %p277_p5 = scmp.lt.s32.totalorder %s164_s15, %s164_s15 }
  0x2d   :  { %v43_v10 = vpack.c.bf16 %v42_v9, %v42_v9  ;;  %v173_v11 = vld [vmem:[%s378_s2] ss:$0 sm:$0xff]  ;;  %p273_p4 = scmp.ne.s32.totalorder %s164_s15, %s272_s16  ;;  %p278_p6 = scmp.lt.s32.totalorder %s272_s16, %s272_s16 }
  0x2f   :  { %194 = vmatpush3.bf16.msra.mxu0 %v219_v2  ;;  %p279_p7 = por %p278_p6, %p277_p5 }
  0x30   :  { %195 = vmatprep.subr.bf16.mxu0 %v304_v0 }
  0x31   :  { %p280_p8 = pnand %p279_p7, %p273_p4 }
  0x33   :  { %196 = vmatpush3.bf16.msra.mxu0 %v220_v3 }
  0x34   :  { %197 = vmatprep.subr.bf16.mxu0 %v304_v0 }
  0x37   :  { %198 = vmatpush3.bf16.msra.mxu0 %v221_v4 }
  0x38   :  { %199 = vmatprep.subr.bf16.mxu0 %v304_v0 }
  0x3b   :  { %200 = vmatpush3.bf16.msra.mxu0 %v222_v5 }
  0x3c   :  { %201 = vmatprep.subr.bf16.mxu0 %v304_v0 }
  0x3f   :  { %202 = vmatpush3.bf16.msra.mxu0 %v223_v6 }
  0x40   :  { %203 = vmatprep.subr.bf16.mxu0 %v304_v0 }
  0x43   :  { %204 = vmatpush3.bf16.msra.mxu0 %v224_v7 }
  0x44   :  { %205 = vmatprep.subr.bf16.mxu0 %v304_v0 }
  0x47   :  { %206 = vmatpush3.bf16.msra.mxu0 %v225_v8 }
  0x4a   :  { %208 = vmatmul.mubr.bf16.vlgmr.msra.gmra.mrb[0].mxu0 %v43_v10 }
 0x11d   :  { %v149_v12 = vpop.f32.mrb[0].mxu0 }
 0x11e   :  { %v150_v13 = vadd.f32 %v173_v11, %v149_v12  ;;  %v209_v14 = vpop.f32.mrb[1].mxu0 }
 0x11f   :  { %v152_v15 = vpop.f32.mrb[2].mxu0 }
 0x120   :  { %226 = vtanh.f32 %v150_v13  ;;  %v210_v16 = vpop.f32.mrb[3].mxu0 }
 0x12a   :  { %v227_v17 = vpop.eup %226 }
 0x12b   :  { %156 = vst [vmem:[#allocation7] sm:$0xff] %v227_v17 }
 0x12c   :  { %283 = shalt.err (!%p280_p8)
}
 0x12d   :  { %s284_s18 = scalar_lea.hbm %s379_s3, 128 }
 0x12e   :  { %p285_p9 = scmp.ne.s32.totalorder %s379_s3, %s284_s18  ;;  %p288_p10 = scmp.lt.u32.totalorder %s284_s18, %s379_s3 }
 0x130   :  { %p290_p11 = pnand %p288_p10, %p285_p9 }
 0x132   :  { %293 = shalt.err (!%p290_p11)
}
 0x133   :  { %166 = dma.vmem_to_hbm [thread:$0]  %s164_s15, 128, %s379_s3, [#allocation4]  }
 0x134   :  { %298 = dma.done.wait [#allocation4], 128  }
 0x135   :  { %299 = vsyncadd [#allocation4], 4294967168 }
 0x136   :  { %170 = vsyncpa [#allocation3], 1 }
 0x137   :  { %171 = vsyncpa [#allocation6], 1 }
 0x138   :  { %172 = vsyncpa [#allocation4], 1 }

</bundles_post_ra>
